<compile_context>
chip_gen: v5e
topology: v5e:2x2
jax: 0.10.0
libtpu: 0.0.40
codegen_flags: <defaults>
</compile_context>

<pallas_src>
import functools

import jax
import jax.numpy as jnp
from jax.experimental import pallas as pl
from jax.experimental.pallas import tpu as pltpu


def _round_up(x, m):
    return (x + m - 1) // m * m


def dqn_mlp_kernel(x_ref, w1_ref, b1_ref, w2_ref, b2_ref, o_ref):
    # Layer 1 on the MXU: [TB, S] @ [S, H] -> [TB, H] (f32 accumulation).
    h = jnp.dot(x_ref[...], w1_ref[...], preferred_element_type=jnp.float32)
    h = jnp.maximum(h + b1_ref[...], 0.0)          # bias + ReLU on the VPU

    # Layer 2 on the MXU: [TB, H] @ [H, A] -> [TB, A].
    q = jnp.dot(h, w2_ref[...], preferred_element_type=jnp.float32)
    # Bias add kept as a tiny broadcast add (folding b2 into W2 would need a
    # materialized concat of h, which costs more than this single pass).
    o_ref[...] = (q + b2_ref[...]).astype(o_ref.dtype)


def prepare_params(w1, b1, w2, b2):
    """One-time parameter prep (kept off the per-call jit path): 2-D biases."""
    return w1, b1.reshape(1, -1), w2, b2.reshape(1, -1)


@functools.partial(jax.jit, static_argnames=("tile_b",))
def dqn_forward(x, w1, b1_2d, w2, b2_2d, *, tile_b=512):
    """x: [B, state_dim]; returns Q-values [B, action_dim]."""
    B, S = x.shape
    H = w1.shape[1]
    A = w2.shape[1]

    # Batch tile: multiple of 8 (sublane constraint), never larger than the
    # (rounded) batch, and split so we get >=2 parallel grid steps when the
    # batch is big enough -- both TensorCores get work on v7x.
    TB = min(tile_b, _round_up(B, 8))
    if B >= 512:
        TB = min(TB, max(256, _round_up(pl.cdiv(B, 2), 8)))

    grid = (pl.cdiv(B, TB),)   # ragged final block handled by Pallas masking

    out = pl.pallas_call(
        dqn_mlp_kernel,
        out_shape=jax.ShapeDtypeStruct((B, A), x.dtype),
        grid_spec=pltpu.PrefetchScalarGridSpec(
            num_scalar_prefetch=0,
            grid=grid,
            in_specs=[
                pl.BlockSpec((TB, S), lambda i: (i, 0)),   # x: tiled over batch
                pl.BlockSpec((S, H), lambda i: (0, 0)),    # W1: VMEM-resident
                pl.BlockSpec((1, H), lambda i: (0, 0)),    # b1: resident
                pl.BlockSpec((H, A), lambda i: (0, 0)),    # W2: resident
                pl.BlockSpec((1, A), lambda i: (0, 0)),    # b2: resident
            ],
            out_specs=pl.BlockSpec((TB, A), lambda i: (i, 0)),
        ),
        compiler_params=pltpu.CompilerParams(
            # Batch steps are independent: shard across both TensorCores on
            # v7x; harmless on single-TC v5e/v6e.
            dimension_semantics=("parallel",)),
    )(x, w1, b1_2d, w2, b2_2d)

    return out


if __name__ == "__main__":
    # Small shapes consistent with a DQN Q-net.
    batch, state_dim, hidden_dim, action_dim = 8, 4, 32, 2

    key = jax.random.PRNGKey(0)
    kx, k1, kb1, k2, kb2 = jax.random.split(key, 5)

    x = jax.random.normal(kx, (batch, state_dim), dtype=jnp.float32)
    # Deterministic synthetic parameters (uniform like torch Linear default init).
    lim1 = 1.0 / (state_dim ** 0.5)
    w1 = jax.random.uniform(k1, (state_dim, hidden_dim), jnp.float32, -lim1, lim1)
    b1 = jax.random.uniform(kb1, (hidden_dim,), jnp.float32, -lim1, lim1)
    lim2 = 1.0 / (hidden_dim ** 0.5)
    w2 = jax.random.uniform(k2, (hidden_dim, action_dim), jnp.float32, -lim2, lim2)
    b2 = jax.random.uniform(kb2, (action_dim,), jnp.float32, -lim2, lim2)

    # One-time parameter prep (kept out of the per-call path).
    params = prepare_params(w1, b1, w2, b2)

    # Small-batch path (single grid step).
    out = jax.block_until_ready(dqn_forward(x, *params))
    ref = jnp.maximum(x @ w1 + b1, 0.0) @ w2 + b2
    assert out.shape == (batch, action_dim)
    assert jnp.allclose(out, ref, atol=1e-5, rtol=1e-5)

    # Larger batch exercises the multi-step parallel grid path, including a
    # ragged (non-divisible) final block.
    big_b = 1000
    xb = jax.random.normal(kx, (big_b, state_dim), dtype=jnp.float32)
    outb = jax.block_until_ready(dqn_forward(xb, *params))
    refb = jnp.maximum(xb @ w1 + b1, 0.0) @ w2 + b2
    assert outb.shape == (big_b, action_dim)
    assert jnp.allclose(outb, refb, atol=1e-5, rtol=1e-5)

    print("KERNEL_OK")
</pallas_src>

<mosaic_0001>
module attributes {stable_mosaic.version = 11 : i64} {
  func.func @dqn_mlp_kernel(%arg0: i32, %arg1: memref<8x4xf32, #tpu.memory_space<vmem>>, %arg2: memref<4x32xf32, #tpu.memory_space<vmem>>, %arg3: memref<1x32xf32, #tpu.memory_space<vmem>>, %arg4: memref<32x2xf32, #tpu.memory_space<vmem>>, %arg5: memref<1x2xf32, #tpu.memory_space<vmem>>, %arg6: memref<8x2xf32, #tpu.memory_space<vmem>>) attributes {dimension_semantics = [#tpu.dimension_semantics<parallel>], iteration_bounds = array<i64: 1>, scalar_prefetch = 0 : i64, scratch_operands = 0 : i64, tpu.core_type = #tpu.core_type<tc>, window_params = [{transform_indices = @transform_0, window_bounds = array<i64: 8, 4>}, {pipeline_mode = #tpu.pipeline_mode<synchronous>, transform_indices = @transform_1, window_bounds = array<i64: 4, 32>}, {pipeline_mode = #tpu.pipeline_mode<synchronous>, transform_indices = @transform_2, window_bounds = array<i64: 1, 32>}, {pipeline_mode = #tpu.pipeline_mode<synchronous>, transform_indices = @transform_3, window_bounds = array<i64: 32, 2>}, {pipeline_mode = #tpu.pipeline_mode<synchronous>, transform_indices = @transform_4, window_bounds = array<i64: 1, 2>}, {transform_indices = @transform_5, window_bounds = array<i64: 8, 2>}]} {
    %c0 = arith.constant 0 : index
    %c0_0 = arith.constant 0 : index
    %0 = vector.load %arg1[%c0, %c0_0] : memref<8x4xf32, #tpu.memory_space<vmem>>, vector<8x4xf32>
    %c0_1 = arith.constant 0 : index
    %c0_2 = arith.constant 0 : index
    %1 = vector.load %arg2[%c0_1, %c0_2] : memref<4x32xf32, #tpu.memory_space<vmem>>, vector<4x32xf32>
    %cst = arith.constant dense<0.000000e+00> : vector<8x32xf32>
    %2 = tpu.matmul %0, %1, %cst {dimension_numbers = #tpu.dot_dimension_numbers<[1], [0], [0], [1], [0, 0, 1, 1], [], []>} : vector<8x4xf32>, vector<4x32xf32>, vector<8x32xf32> -> vector<8x32xf32>
    %c0_3 = arith.constant 0 : index
    %c0_4 = arith.constant 0 : index
    %3 = vector.load %arg3[%c0_3, %c0_4] : memref<1x32xf32, #tpu.memory_space<vmem>>, vector<1x32xf32>
    %4 = vector.broadcast %3 : vector<1x32xf32> to vector<8x32xf32>
    %5 = arith.addf %2, %4 : vector<8x32xf32>
    %cst_5 = arith.constant 0.000000e+00 : f32
    %6 = vector.broadcast %cst_5 : f32 to vector<8x32xf32>
    %7 = arith.maximumf %5, %6 : vector<8x32xf32>
    %c0_6 = arith.constant 0 : index
    %c0_7 = arith.constant 0 : index
    %8 = vector.load %arg4[%c0_6, %c0_7] : memref<32x2xf32, #tpu.memory_space<vmem>>, vector<32x2xf32>
    %cst_8 = arith.constant dense<0.000000e+00> : vector<8x2xf32>
    %9 = tpu.matmul %7, %8, %cst_8 {dimension_numbers = #tpu.dot_dimension_numbers<[1], [0], [0], [1], [0, 0, 1, 1], [], []>} : vector<8x32xf32>, vector<32x2xf32>, vector<8x2xf32> -> vector<8x2xf32>
    %c0_9 = arith.constant 0 : index
    %c0_10 = arith.constant 0 : index
    %10 = vector.load %arg5[%c0_9, %c0_10] : memref<1x2xf32, #tpu.memory_space<vmem>>, vector<1x2xf32>
    %11 = vector.broadcast %10 : vector<1x2xf32> to vector<8x2xf32>
    %12 = arith.addf %9, %11 : vector<8x2xf32>
    %c0_11 = arith.constant 0 : index
    %c0_12 = arith.constant 0 : index
    %13 = vector.load %arg6[%c0_11, %c0_12] : memref<8x2xf32, #tpu.memory_space<vmem>>, vector<8x2xf32>
    tpu.vector_store %arg6[%c0_11, %c0_12], %12 {strides = array<i32>} : memref<8x2xf32, #tpu.memory_space<vmem>>, vector<8x2xf32>,
    return
  }
  func.func @transform_0(%arg0: i32) -> (i32, i32) {
    %c0_i32 = arith.constant 0 : i32
    %c0_i32_0 = arith.constant 0 : i32
    return %arg0, %c0_i32 : i32, i32
  }
  func.func @transform_1(%arg0: i32) -> (i32, i32) {
    %c0_i32 = arith.constant 0 : i32
    %c0_i32_0 = arith.constant 0 : i32
    %c0_i32_1 = arith.constant 0 : i32
    return %c0_i32, %c0_i32_0 : i32, i32
  }
  func.func @transform_2(%arg0: i32) -> (i32, i32) {
    %c0_i32 = arith.constant 0 : i32
    %c0_i32_0 = arith.constant 0 : i32
    %c0_i32_1 = arith.constant 0 : i32
    return %c0_i32, %c0_i32_0 : i32, i32
  }
  func.func @transform_3(%arg0: i32) -> (i32, i32) {
    %c0_i32 = arith.constant 0 : i32
    %c0_i32_0 = arith.constant 0 : i32
    %c0_i32_1 = arith.constant 0 : i32
    return %c0_i32, %c0_i32_0 : i32, i32
  }
  func.func @transform_4(%arg0: i32) -> (i32, i32) {
    %c0_i32 = arith.constant 0 : i32
    %c0_i32_0 = arith.constant 0 : i32
    %c0_i32_1 = arith.constant 0 : i32
    return %c0_i32, %c0_i32_0 : i32, i32
  }
  func.func @transform_5(%arg0: i32) -> (i32, i32) {
    %c0_i32 = arith.constant 0 : i32
    %c0_i32_0 = arith.constant 0 : i32
    return %arg0, %c0_i32 : i32, i32
  }
}

</mosaic_0001>

<bundles_post_ra>
// kernel: dqn_forward.1
= control target key start
LH: loop header
LB: loop body
LE: loop exit
PB: predicated region body
PF: predicated region fallthrough
CT: control target
= control target key end

     0   :  { %vm30_vm0 = vcmask 1043456   ;;  %vm26_vm1 = vcmask 31744   ;;  %vm63_vm2 = vcmask 261120   ;;  %vm87_vm3 = vcmask 15360   ;;  %s155_s1 = inlined_call_operand.vmem [shape: f32[4,32], index: 1, kind: input, shape index: {}]   ;;  %s156_s0 = inlined_call_operand.vmem [shape: f32[8,4], index: 0, kind: input, shape index: {}]   ;;  %s157_s3 = inlined_call_operand.vmem [shape: f32[32,2], index: 3, kind: input, shape index: {}]   ;;  %s158_s2 = inlined_call_operand.vmem [shape: f32[1,32], index: 2, kind: input, shape index: {}]   ;;  %s159_s4 = inlined_call_operand.vmem [shape: f32[1,2], index: 4, kind: input, shape index: {}]   ;;  %s160_s5 = inlined_call_operand.vmem [shape: f32[8,2], index: 5, kind: output, shape index: {}]  }
   0x1   :  { %v21_v0 = vld [vmem:[%s155_s1] sm:$0xf]  ;;  %v58_v2 = vld [vmem:[%s157_s3 + $0x18] sm:$0xff]  ;;  %v57_v3 = vld [vmem:[%s157_s3 + $0x10] sm:$0xff] }
   0x2   :  { %v20_v1 = vld [vmem:[%s156_s0] sm:$0xff]  ;;  %93 = vmatpush.msk.msra.mxu0 %vm30_vm0, %v21_v0  ;;  %79 = vmatpush.msra.mxu1 %v58_v2  ;;  %v56_v4 = vld [vmem:[%s157_s3 + $0x8] sm:$0xff] }
   0x3   :  { %94 = vmatmul.msk.f32.vlgmr.msra.gmra.mxu0 %vm26_vm1, %v20_v1  ;;  %v55_v5 = vld [vmem:[%s157_s3] sm:$0xff] }
   0x4   :  { %80 = vmatpush.msra.mxu1 %v57_v3  ;;  %v96_v6 = vld [vmem:[%s158_s2] ss:$0 sm:$0xff] }
   0x5   :  { %v97_v10 = vld [vmem:[%s159_s4] ss:$0 sm:$0xff] }
   0x6   :  { %81 = vmatpush.msra.mxu1 %v56_v4 }
   0x8   :  { %82 = vmatpush.msra.mxu1 %v55_v5 }
  0x80   :  { %v51_v7 = vpop.f32.mrf.mxu0 }
  0x81   :  { %v52_v8 = vadd.f32 %v96_v6, %v51_v7 }
  0x83   :  { %v54_v9 = vmax.f32 %v52_v8, 0.0 }
  0x85   :  { %95 = vmatmul.msk.f32.vlgmr.msra.gmra.mxu1 %vm63_vm2, %v54_v9 }
 0x102   :  { %v84_v11 = vpop.f32.mrf.mxu1 }
 0x103   :  { %v85_v12 = vadd.f32 %v97_v10, %v84_v11 }
 0x105   :  { %88 = vst.msk [vmem:[%s160_s5] sm:$0xff] %vm87_vm3, %v85_v12 }

</bundles_post_ra>
